<compile_context>
chip_gen: v6e
topology: v6e:2x2x1
jax: 0.10.0
libtpu: 0.0.40
codegen_flags: <defaults>
</compile_context>

<pallas_src>
import jax
import jax.numpy as jnp
from jax import lax
from jax.experimental import pallas as pl
from jax.experimental.pallas import tpu as pltpu

BN_EPS = 1e-5
LEAKY_SLOPE = 0.1
_HI = lax.Precision.HIGHEST


def _round_up(x, m):
    return (x + m - 1) // m * m


def _discriminator_kernel(x_ref, w1f_ref, bias1_ref, w2t_ref, b2t_ref, o_ref):
    """Fused (Linear1 + folded BN) -> LeakyReLU -> Linear2, transposed output.

    x_ref    : (tile_b, n_class)  f32
    w1f_ref  : (n_class, dp)      f32   W1 with BN scale folded in
    bias1_ref: (1, dp)            f32   folded bias (b1-mean)*scale + beta
    w2t_ref  : (nrow, dp)         f32   W2^T, zero padded
    b2t_ref  : (nrow, 1)          f32   b2 as a column
    o_ref    : (nrow, tile_b)     f32   transposed output tile (lane = batch)
    """
    # Linear 1 with BatchNorm folded in (MXU, f32 accumulate).
    h = jnp.dot(x_ref[...], w1f_ref[...],
                preferred_element_type=jnp.float32, precision=_HI)
    h = h + bias1_ref[...]                      # (tile_b, dp)

    # LeakyReLU(0.1): one mul + one max on the VPU.
    a = jnp.maximum(h, LEAKY_SLOPE * h)

    # Linear 2, computed transposed: (nrow, dp) x (tile_b, dp)^T -> (nrow, tile_b)
    out_t = lax.dot_general(w2t_ref[...], a,
                            dimension_numbers=(((1,), (1,)), ((), ())),
                            preferred_element_type=jnp.float32, precision=_HI)
    o_ref[...] = out_t + b2t_ref[...]           # lane-dense store


def discriminator_forward(x, params, *, max_tile_b=512):
    """x: [B, n_class] float32; params as returned by init_params (float32)."""
    w1, b1, gamma, beta, w2, b2 = params
    B, n_class = x.shape
    n_dense = w1.shape[1]
    n_domain = w2.shape[1]

    x = x.astype(jnp.float32)

    # ---- Batch statistics of h = x@W1 + b1 via the centered gram trick ----
    # mean_h = mean(x)@W1 + b1 ;  var_h[j] = W1[:,j]^T Cov(x) W1[:,j]  (biased).
    # Tiny O(B*n_class^2) XLA ops; avoids materializing the dp-wide h and the
    # one-pass E[h^2]-E[h]^2 cancellation.
    xm = jnp.mean(x, axis=0)                                            # (n_class,)
    xc = x - xm
    gram_c = jnp.matmul(xc.T, xc, precision=_HI)                        # (n_class, n_class)
    mean_h = jnp.matmul(xm, w1, precision=_HI) + b1                     # (n_dense,)
    var_h = jnp.sum(w1 * jnp.matmul(gram_c, w1, precision=_HI), axis=0) / B

    # ---- Fold BatchNorm into Linear 1 (f32, parameter-space only) ----
    scale = gamma * lax.rsqrt(var_h + BN_EPS)
    w1f = w1 * scale[None, :]
    bias1 = (b1 - mean_h) * scale + beta

    # ---- Padded, lane-friendly layouts ----
    dp = _round_up(n_dense, 128)          # hidden width (lane-dense)
    nrow = _round_up(n_domain, 8)         # transposed-output sublane rows
    tile_b = min(max_tile_b, _round_up(B, 128))   # batch tile, multiple of 128
    b_pad = _round_up(B, tile_b)
    nb = b_pad // tile_b

    x_p = jnp.pad(x, ((0, b_pad - B), (0, 0)))
    w1f_p = jnp.pad(w1f, ((0, 0), (0, dp - n_dense))).astype(jnp.float32)
    bias1_p = jnp.zeros((1, dp), jnp.float32).at[0, :n_dense].set(bias1)
    w2t_p = jnp.zeros((nrow, dp), jnp.float32).at[:n_domain, :n_dense].set(w2.T)
    b2t_p = jnp.zeros((nrow, 1), jnp.float32).at[:n_domain, 0].set(b2)

    out_t = pl.pallas_call(
        _discriminator_kernel,
        out_shape=jax.ShapeDtypeStruct((nrow, b_pad), jnp.float32),
        grid_spec=pltpu.PrefetchScalarGridSpec(
            num_scalar_prefetch=0,
            grid=(nb,),                                        # batch tiles only
            in_specs=[
                pl.BlockSpec((tile_b, n_class), lambda t: (t, 0)),   # x tile
                pl.BlockSpec((n_class, dp), lambda t: (0, 0)),       # W1 folded
                pl.BlockSpec((1, dp), lambda t: (0, 0)),             # folded bias
                pl.BlockSpec((nrow, dp), lambda t: (0, 0)),          # W2^T
                pl.BlockSpec((nrow, 1), lambda t: (0, 0)),           # b2 column
            ],
            out_specs=pl.BlockSpec((nrow, tile_b), lambda t: (0, t)),
        ),
        compiler_params=pltpu.CompilerParams(
            # Single independent batch-tile axis: megacore-shardable on v7x.
            dimension_semantics=("parallel",),
            vmem_limit_bytes=32 * 1024 * 1024,
        ),
    )(x_p, w1f_p, bias1_p, w2t_p, b2t_p)

    # Un-transpose and strip padding in the wrapper (tiny).
    return out_t[:n_domain, :B].T


def init_params(key, n_class, n_dense, n_domain):
    k1, k2, k3, k4 = jax.random.split(key, 4)
    bound1 = 1.0 / (n_class ** 0.5)
    w1 = jax.random.uniform(k1, (n_class, n_dense), jnp.float32, -bound1, bound1)
    b1 = jax.random.uniform(k2, (n_dense,), jnp.float32, -bound1, bound1)
    gamma = jnp.ones((n_dense,), jnp.float32)     # BatchNorm1d weight
    beta = jnp.zeros((n_dense,), jnp.float32)     # BatchNorm1d bias
    bound2 = 1.0 / (n_dense ** 0.5)
    w2 = jax.random.uniform(k3, (n_dense, n_domain), jnp.float32, -bound2, bound2)
    b2 = jax.random.uniform(k4, (n_domain,), jnp.float32, -bound2, bound2)
    return (w1, b1, gamma, beta, w2, b2)


def reference_forward(x, params):
    # Pure-JAX f32 reference matching PyTorch semantics (training-mode BN,
    # biased variance), with HIGHEST-precision matmuls.
    w1, b1, gamma, beta, w2, b2 = params
    h = jnp.matmul(x, w1, precision=_HI) + b1
    mean = jnp.mean(h, axis=0, keepdims=True)
    var = jnp.mean((h - mean) ** 2, axis=0, keepdims=True)
    hn = (h - mean) * lax.rsqrt(var + BN_EPS) * gamma + beta
    a = jnp.where(hn >= 0, hn, LEAKY_SLOPE * hn)
    return jnp.matmul(a, w2, precision=_HI) + b2


if __name__ == "__main__":
    n_class, n_dense, n_domain = 4, 10, 2
    batch = 8

    key = jax.random.PRNGKey(0)
    kx, kp = jax.random.split(key)
    x = jax.random.normal(kx, (batch, n_class), jnp.float32)
    params = init_params(kp, n_class, n_dense, n_domain)

    out = discriminator_forward(x, params)
    out = jax.block_until_ready(out)

    ref = reference_forward(x, params)
    assert out.shape == (batch, n_domain)
    max_err = float(jnp.max(jnp.abs(out - ref)))
    assert jnp.allclose(out, ref, atol=1e-3, rtol=1e-3), max_err

    print("KERNEL_OK")
</pallas_src>

<mosaic_0001>
module attributes {stable_mosaic.version = 11 : i64} {
  func.func @_discriminator_kernel(%arg0: i32, %arg1: memref<128x4xf32, #tpu.memory_space<vmem>>, %arg2: memref<4x128xf32, #tpu.memory_space<vmem>>, %arg3: memref<1x128xf32, #tpu.memory_space<vmem>>, %arg4: memref<8x128xf32, #tpu.memory_space<vmem>>, %arg5: memref<8x1xf32, #tpu.memory_space<vmem>>, %arg6: memref<8x128xf32, #tpu.memory_space<vmem>>) attributes {dimension_semantics = [#tpu.dimension_semantics<parallel>], iteration_bounds = array<i64: 1>, scalar_prefetch = 0 : i64, scratch_operands = 0 : i64, tpu.core_type = #tpu.core_type<tc>, window_params = [{transform_indices = @transform_0, window_bounds = array<i64: 128, 4>}, {pipeline_mode = #tpu.pipeline_mode<synchronous>, transform_indices = @transform_1, window_bounds = array<i64: 4, 128>}, {pipeline_mode = #tpu.pipeline_mode<synchronous>, transform_indices = @transform_2, window_bounds = array<i64: 1, 128>}, {pipeline_mode = #tpu.pipeline_mode<synchronous>, transform_indices = @transform_3, window_bounds = array<i64: 8, 128>}, {pipeline_mode = #tpu.pipeline_mode<synchronous>, transform_indices = @transform_4, window_bounds = array<i64: 8, 1>}, {transform_indices = @transform_5, window_bounds = array<i64: 8, 128>}]} {
    %c0 = arith.constant 0 : index
    %c0_0 = arith.constant 0 : index
    %0 = vector.load %arg1[%c0, %c0_0] : memref<128x4xf32, #tpu.memory_space<vmem>>, vector<128x4xf32>
    %c0_1 = arith.constant 0 : index
    %c0_2 = arith.constant 0 : index
    %1 = vector.load %arg2[%c0_1, %c0_2] : memref<4x128xf32, #tpu.memory_space<vmem>>, vector<4x128xf32>
    %cst = arith.constant dense<0.000000e+00> : vector<128x128xf32>
    %2 = tpu.matmul %0, %1, %cst {dimension_numbers = #tpu.dot_dimension_numbers<[1], [0], [0], [1], [0, 0, 1, 1], [], []>, precision = #tpu.contract_precision<fp32>} : vector<128x4xf32>, vector<4x128xf32>, vector<128x128xf32> -> vector<128x128xf32>
    %c0_3 = arith.constant 0 : index
    %c0_4 = arith.constant 0 : index
    %3 = vector.load %arg3[%c0_3, %c0_4] : memref<1x128xf32, #tpu.memory_space<vmem>>, vector<1x128xf32>
    %4 = vector.broadcast %3 : vector<1x128xf32> to vector<128x128xf32>
    %5 = arith.addf %2, %4 : vector<128x128xf32>
    %cst_5 = arith.constant 1.000000e-01 : f32
    %6 = vector.broadcast %cst_5 : f32 to vector<128x128xf32>
    %7 = arith.mulf %6, %5 : vector<128x128xf32>
    %8 = arith.maximumf %5, %7 : vector<128x128xf32>
    %c0_6 = arith.constant 0 : index
    %c0_7 = arith.constant 0 : index
    %9 = vector.load %arg4[%c0_6, %c0_7] : memref<8x128xf32, #tpu.memory_space<vmem>>, vector<8x128xf32>
    %cst_8 = arith.constant dense<0.000000e+00> : vector<8x128xf32>
    %10 = tpu.matmul %9, %8, %cst_8 {dimension_numbers = #tpu.dot_dimension_numbers<[1], [1], [0], [0], [0, 0, 1, 0], [], []>, precision = #tpu.contract_precision<fp32>} : vector<8x128xf32>, vector<128x128xf32>, vector<8x128xf32> -> vector<8x128xf32>
    %c0_9 = arith.constant 0 : index
    %c0_10 = arith.constant 0 : index
    %11 = vector.load %arg5[%c0_9, %c0_10] : memref<8x1xf32, #tpu.memory_space<vmem>>, vector<8x1xf32>
    %12 = vector.broadcast %11 : vector<8x1xf32> to vector<8x128xf32>
    %13 = arith.addf %10, %12 : vector<8x128xf32>
    %c0_11 = arith.constant 0 : index
    %c0_12 = arith.constant 0 : index
    %14 = vector.load %arg6[%c0_11, %c0_12] : memref<8x128xf32, #tpu.memory_space<vmem>>, vector<8x128xf32>
    tpu.vector_store %arg6[%c0_11, %c0_12], %13 {strides = array<i32>} : memref<8x128xf32, #tpu.memory_space<vmem>>, vector<8x128xf32>,
    return
  }
  func.func @transform_0(%arg0: i32) -> (i32, i32) {
    %c0_i32 = arith.constant 0 : i32
    %c0_i32_0 = arith.constant 0 : i32
    return %arg0, %c0_i32 : i32, i32
  }
  func.func @transform_1(%arg0: i32) -> (i32, i32) {
    %c0_i32 = arith.constant 0 : i32
    %c0_i32_0 = arith.constant 0 : i32
    %c0_i32_1 = arith.constant 0 : i32
    return %c0_i32, %c0_i32_0 : i32, i32
  }
  func.func @transform_2(%arg0: i32) -> (i32, i32) {
    %c0_i32 = arith.constant 0 : i32
    %c0_i32_0 = arith.constant 0 : i32
    %c0_i32_1 = arith.constant 0 : i32
    return %c0_i32, %c0_i32_0 : i32, i32
  }
  func.func @transform_3(%arg0: i32) -> (i32, i32) {
    %c0_i32 = arith.constant 0 : i32
    %c0_i32_0 = arith.constant 0 : i32
    %c0_i32_1 = arith.constant 0 : i32
    return %c0_i32, %c0_i32_0 : i32, i32
  }
  func.func @transform_4(%arg0: i32) -> (i32, i32) {
    %c0_i32 = arith.constant 0 : i32
    %c0_i32_0 = arith.constant 0 : i32
    %c0_i32_1 = arith.constant 0 : i32
    return %c0_i32, %c0_i32_0 : i32, i32
  }
  func.func @transform_5(%arg0: i32) -> (i32, i32) {
    %c0_i32 = arith.constant 0 : i32
    %c0_i32_0 = arith.constant 0 : i32
    return %c0_i32, %arg0 : i32, i32
  }
}

</mosaic_0001>

<bundles_post_ra>
// kernel: tpu_custom_call.1
= control target key start
LH: loop header
LB: loop body
LE: loop exit
PB: predicated region body
PF: predicated region fallthrough
CT: control target
= control target key end

     0   :  { %vm94_vm0 = vcmask 1043456   ;;  %vm45_vm1 = vcmask 31744   ;;  %s3301_s0 = inlined_call_operand.vmem [shape: f32[128,4], index: 0, kind: input, shape index: {}]   ;;  %s3302_s1 = inlined_call_operand.vmem [shape: f32[4,128], index: 1, kind: input, shape index: {}]   ;;  %s3303_s2 = inlined_call_operand.vmem [shape: f32[1,128], index: 2, kind: input, shape index: {}]   ;;  %s3304_s3 = inlined_call_operand.vmem [shape: f32[8,128], index: 3, kind: input, shape index: {}]   ;;  %s3305_s4 = inlined_call_operand.vmem [shape: f32[8,1], index: 4, kind: input, shape index: {}]   ;;  %s3306_s5 = inlined_call_operand.hbm [shape: f32[8,128], index: 5, kind: output, shape index: {}]  }
   0x1   :  { %v37_v0 = vld [vmem:[%s3302_s1] sm:$0xf]  ;;  %v22_v2 = vld [vmem:[%s3301_s0 + $0x8] sm:$0xff]  ;;  %v23_v6 = vld [vmem:[%s3301_s0 + $0x10] sm:$0xff] }
   0x2   :  { %v21_v1 = vld [vmem:[%s3301_s0] sm:$0xff]  ;;  %v96_v3 = vsel %vm94_vm0, %v37_v0, 0  ;;  %v50_v5 = vsel %vm45_vm1, %v22_v2, 0  ;;  %v24_v7 = vld [vmem:[%s3301_s0 + $0x18] sm:$0xff]  ;;  %v53_v12 = vsel %vm45_vm1, %v23_v6, 0  ;;  %v26_v13 = vld [vmem:[%s3301_s0 + $0x28] sm:$0xff] }
   0x3   :  { %v47_v4 = vsel %vm45_vm1, %v21_v1, 0  ;;  %v25_v8 = vld [vmem:[%s3301_s0 + $0x20] sm:$0xff]  ;;  %v2536_v9 = vand.u32 4294901760, %v96_v3  ;;  %v2540_v11 = vand.u32 4294901760, %v50_v5  ;;  %v27_v14 = vld [vmem:[%s3301_s0 + $0x30] sm:$0xff]  ;;  %v2549_v15 = vand.u32 4294901760, %v53_v12 }
   0x4   :  { %v2538_v10 = vand.u32 4294901760, %v47_v4  ;;  %v56_v16 = vsel %vm45_vm1, %v24_v7, 0  ;;  %v59_v17 = vsel %vm45_vm1, %v25_v8, 0  ;;  %v62_v18 = vsel %vm45_vm1, %v26_v13, 0 }
   0x5   :  { %2089 = vmatprep.subr.mxu0 %v2536_v9  ;;  %v356_v20 = vsub.f32 %v96_v3, %v2536_v9  ;;  %v2560_v21 = vsub.f32 %v50_v5, %v2540_v11  ;;  %v2563_v22 = vand.u32 4294901760, %v56_v16  ;;  %v2567_v23 = vsub.f32 %v53_v12, %v2549_v15 }
   0x6   :  { %v2556_v19 = vsub.f32 %v47_v4, %v2538_v10  ;;  %2117 = vmatprep.mubr.f32.mxu1 %v2538_v10  ;;  %2090 = vmatpush3.msra.mxu0 %v2536_v9  ;;  %v2569_v24 = vand.u32 4294901760, %v59_v17  ;;  %v2571_v25 = vand.u32 4294901760, %v62_v18  ;;  %v65_v26 = vsel %vm45_vm1, %v27_v14, 0 }
   0x7   :  { %v2575_v28 = vand.u32 4294901760, %v356_v20  ;;  %2141 = vmatprep.subr.mxu0 %v356_v20  ;;  %v176_v29 = vand.u32 4294901760, %v2560_v21  ;;  %v2579_v30 = vsub.f32 %v56_v16, %v2563_v22 }
   0x8   :  { %v166_v27 = vand.u32 4294901760, %v2556_v19 }
   0x9   :  { %10 = vsyncpa [#allocation3], 0  ;;  %v186_v31 = vand.u32 4294901760, %v2567_v23  ;;  %v2583_v32 = vsub.f32 %v59_v17, %v2569_v24  ;;  %v2586_v33 = vsub.f32 %v62_v18, %v2571_v25  ;;  %v2588_v34 = vand.u32 4294901760, %v65_v26  ;;  %v28_v43 = vld [vmem:[%s3301_s0 + $0x38] sm:$0xff]  ;;  %v29_v44 = vld [vmem:[%s3301_s0 + $0x40] sm:$0xff] }
   0xa   :  { %v167_v35 = vsub.f32 %v2556_v19, %v166_v27  ;;  %v358_v36 = vsub.f32 %v356_v20, %v2575_v28  ;;  %v177_v37 = vsub.f32 %v2560_v21, %v176_v29  ;;  %v196_v38 = vand.u32 4294901760, %v2579_v30  ;;  %v30_v45 = vld [vmem:[%s3301_s0 + $0x48] sm:$0xff]  ;;  %v31_v54 = vld [vmem:[%s3301_s0 + $0x50] sm:$0xff]  ;;  %v32_v55 = vld [vmem:[%s3301_s0 + $0x58] sm:$0xff] }
   0xb   :  { %v187_v39 = vsub.f32 %v2567_v23, %v186_v31  ;;  %v206_v40 = vand.u32 4294901760, %v2583_v32  ;;  %v216_v41 = vand.u32 4294901760, %v2586_v33  ;;  %v2604_v42 = vsub.f32 %v65_v26, %v2588_v34  ;;  %v33_v0 = vld [vmem:[%s3301_s0 + $0x60] sm:$0xff]  ;;  %v34_v1 = vld [vmem:[%s3301_s0 + $0x68] sm:$0xff]  ;;  %v35_v13 = vld [vmem:[%s3301_s0 + $0x70] sm:$0xff] }
   0xc   :  { %v168_v46 = vand.u32 4294901760, %v167_v35  ;;  %v359_v47 = vand.u32 4294901760, %v358_v36  ;;  %v178_v48 = vand.u32 4294901760, %v177_v37  ;;  %v197_v49 = vsub.f32 %v2579_v30, %v196_v38 }
   0xd   :  { %v188_v50 = vand.u32 4294901760, %v187_v39  ;;  %v207_v51 = vsub.f32 %v2583_v32, %v206_v40  ;;  %v217_v52 = vsub.f32 %v2586_v33, %v216_v41  ;;  %v226_v53 = vand.u32 4294901760, %v2604_v42 }
   0xe   :  { %2091 = vmatprep.mubr.f32.mxu0 %v168_v46  ;;  %2115 = vmatprep.subr.mxu1 %v359_v47  ;;  %v198_v56 = vand.u32 4294901760, %v197_v49  ;;  %v68_v57 = vsel %vm45_vm1, %v28_v43, 0  ;;  %v71_v58 = vsel %vm45_vm1, %v29_v44, 0  ;;  %v74_v59 = vsel %vm45_vm1, %v30_v45, 0 }
   0xf   :  { %2092 = vmatmul.mubr.f32.vlgmr.msra.gmra.mxu0 %v178_v48  ;;  %2116 = vmatpush3.msra.mxu1 %v359_v47  ;;  %v208_v60 = vand.u32 4294901760, %v207_v51  ;;  %v218_v61 = vand.u32 4294901760, %v217_v52  ;;  %v227_v62 = vsub.f32 %v2604_v42, %v226_v53  ;;  %v2637_v63 = vand.u32 4294901760, %v68_v57 }
  0x10   :  { %2142 = vmatpush3.msra.mxu0 %v356_v20  ;;  %2118 = vmatmul.mubr.f32.vlgmr.msra.gmra.mxu1 %v2540_v11  ;;  %v2646_v2 = vand.u32 4294901760, %v71_v58  ;;  %v2648_v3 = vand.u32 4294901760, %v74_v59  ;;  %v77_v4 = vsel %vm45_vm1, %v31_v54, 0  ;;  %v80_v5 = vsel %vm45_vm1, %v32_v55, 0 }
  0x11   :  { %2167 = vmatprep.subr.mxu1 %v2536_v9  ;;  %2094 = vmatprep.mubr.f32.mxu0 %v188_v50  ;;  %v228_v6 = vand.u32 4294901760, %v227_v62  ;;  %v2654_v7 = vsub.f32 %v68_v57, %v2637_v63  ;;  %v2656_v8 = vand.u32 4294901760, %v77_v4  ;;  %v2658_v12 = vand.u32 4294901760, %v80_v5  ;;  %v36_v50 = vld [vmem:[%s3301_s0 + $0x78] sm:$0xff] }
  0x12   :  { %2168 = vmatpush3.msra.mxu1 %v2536_v9  ;;  %2120 = vmatprep.mubr.f32.mxu1 %v2549_v15  ;;  %v2666_v14 = vsub.f32 %v71_v58, %v2646_v2  ;;  %v2669_v16 = vsub.f32 %v74_v59, %v2648_v3  ;;  %v83_v17 = vsel %vm45_vm1, %v33_v0, 0  ;;  %v86_v18 = vsel %vm45_vm1, %v34_v1, 0 }
  0x13   :  { %2095 = vmatmul.mubr.f32.gmra.mxu0 %v198_v56  ;;  %v236_v20 = vand.u32 4294901760, %v2654_v7  ;;  %v2675_v26 = vsub.f32 %v77_v4, %v2656_v8  ;;  %v2678_v35 = vsub.f32 %v80_v5, %v2658_v12  ;;  %v2680_v36 = vand.u32 4294901760, %v83_v17  ;;  %2193 = vmatprep.subr.mxu0 %v2575_v28 }
  0x14   :  { %2121 = vmatmul.mubr.f32.gmra.mxu1 %v2563_v22  ;;  %2097 = vmatprep.mubr.f32.mxu0 %v208_v60  ;;  %v246_v37 = vand.u32 4294901760, %v2666_v14  ;;  %v256_v39 = vand.u32 4294901760, %v2669_v16  ;;  %v2686_v43 = vand.u32 4294901760, %v86_v18  ;;  %v89_v44 = vsel %vm45_vm1, %v35_v13, 0 }
  0x15   :  { %2123 = vmatprep.mubr.f32.mxu1 %v2569_v24  ;;  %v237_v45 = vsub.f32 %v2654_v7, %v236_v20  ;;  %v266_v46 = vand.u32 4294901760, %v2675_v26  ;;  %v2695_v47 = vsub.f32 %v83_v17, %v2680_v36  ;;  %2219 = vmatprep.subr.mxu1 %v2536_v9  ;;  %v2701_v49 = vand.u32 4294901760, %v89_v44 }
  0x16   :  { %v247_v48 = vsub.f32 %v2666_v14, %v246_v37  ;;  %v257_v52 = vsub.f32 %v2669_v16, %v256_v39  ;;  %v276_v54 = vand.u32 4294901760, %v2678_v35  ;;  %v2711_v55 = vsub.f32 %v86_v18, %v2686_v43 }
  0x17   :  { %2098 = vmatmul.mubr.f32.gmra.mxu0 %v218_v61  ;;  %v238_v51 = vand.u32 4294901760, %v237_v45  ;;  %v267_v57 = vsub.f32 %v2675_v26, %v266_v46  ;;  %v286_v58 = vand.u32 4294901760, %v2695_v47  ;;  %v2719_v59 = vsub.f32 %v89_v44, %v2701_v49 }
  0x18   :  { %2124 = vmatmul.mubr.f32.gmra.mxu1 %v2571_v25  ;;  %2100 = vmatprep.mubr.f32.mxu0 %v228_v6  ;;  %v248_v56 = vand.u32 4294901760, %v247_v48  ;;  %v92_v60 = vsel %vm45_vm1, %v36_v50, 0  ;;  %v258_v62 = vand.u32 4294901760, %v257_v52  ;;  %v277_v0 = vsub.f32 %v2678_v35, %v276_v54 }
  0x19   :  { %2126 = vmatprep.mubr.f32.mxu1 %v2588_v34  ;;  %v2723_v61 = vand.u32 4294901760, %v92_v60  ;;  %v296_v1 = vand.u32 4294901760, %v2711_v55  ;;  %v268_v4 = vand.u32 4294901760, %v267_v57  ;;  %v287_v5 = vsub.f32 %v2695_v47, %v286_v58 }
  0x1a   :  { %v306_v6 = vand.u32 4294901760, %v2719_v59  ;;  %v278_v17 = vand.u32 4294901760, %v277_v0  ;;  %vm2483_vm2 = vmmov 0  }
  0x1b   :  { %2101 = vmatmul.mubr.f32.gmra.mxu0 %v238_v51  ;;  %v315_v13 = vsub.f32 %v92_v60, %v2723_v61  ;;  %v297_v18 = vsub.f32 %v2711_v55, %v296_v1  ;;  %v288_v45 = vand.u32 4294901760, %v287_v5 }
  0x1c   :  { %2127 = vmatmul.mubr.f32.gmra.mxu1 %v2637_v63  ;;  %2103 = vmatprep.mubr.f32.mxu0 %v248_v56  ;;  %v307_v48 = vsub.f32 %v2719_v59, %v306_v6 }
  0x1d   :  { %2129 = vmatprep.mubr.f32.mxu1 %v2646_v2  ;;  %v316_v44 = vand.u32 4294901760, %v315_v13  ;;  %v298_v50 = vand.u32 4294901760, %v297_v18 }
  0x1e   :  { %v308_v52 = vand.u32 4294901760, %v307_v48 }
  0x1f   :  { %2104 = vmatmul.mubr.f32.gmra.mxu0 %v258_v62  ;;  %v317_v51 = vsub.f32 %v315_v13, %v316_v44 }
  0x20   :  { %2130 = vmatmul.mubr.f32.gmra.mxu1 %v2648_v3  ;;  %2106 = vmatprep.mubr.f32.mxu0 %v268_v4 }
  0x21   :  { %2132 = vmatprep.mubr.f32.mxu1 %v2656_v8  ;;  %v318_v56 = vand.u32 4294901760, %v317_v51 }
  0x23   :  { %2107 = vmatmul.mubr.f32.gmra.mxu0 %v278_v17 }
  0x24   :  { %2133 = vmatmul.mubr.f32.gmra.mxu1 %v2658_v12  ;;  %2109 = vmatprep.mubr.f32.mxu0 %v288_v45 }
  0x25   :  { %2135 = vmatprep.mubr.f32.mxu1 %v2680_v36 }
  0x27   :  { %2110 = vmatmul.mubr.f32.gmra.mxu0 %v298_v50 }
  0x28   :  { %2136 = vmatmul.mubr.f32.gmra.mxu1 %v2686_v43  ;;  %2112 = vmatprep.mubr.f32.mxu0 %v308_v52 }
  0x29   :  { %2138 = vmatprep.mubr.f32.mxu1 %v2701_v49 }
  0x2b   :  { %2113 = vmatmul.mubr.f32.gmra.mxu0 %v318_v56 }
  0x2c   :  { %2139 = vmatmul.mubr.f32.gmra.mxu1 %v2723_v61  ;;  %2143 = vmatprep.mubr.f32.mxu0 %v2556_v19 }
  0x2d   :  { %2169 = vmatprep.mubr.f32.mxu1 %v166_v27 }
  0x2f   :  { %2144 = vmatmul.mubr.f32.vlgmr.msra.gmra.mxu0 %v2560_v21 }
  0x30   :  { %2194 = vmatpush3.msra.mxu0 %v2575_v28  ;;  %2170 = vmatmul.mubr.f32.vlgmr.msra.gmra.mxu1 %v176_v29 }
  0x31   :  { %2220 = vmatpush3.msra.mxu1 %v2536_v9  ;;  %2146 = vmatprep.mubr.f32.mxu0 %v2567_v23  ;;  %v2482_v9 = vmov 0.0  }
  0x32   :  { %2172 = vmatprep.mubr.f32.mxu1 %v186_v31  ;;  %2245 = vmatprep.subr.mxu0 %v2482_v9 }
  0x33   :  { %2147 = vmatmul.mubr.f32.gmra.mxu0 %v2579_v30  ;;  %2280 = vmatprep.subr.mxu1 %v2482_v9 }
  0x34   :  { %2173 = vmatmul.mubr.f32.gmra.mxu1 %v196_v38  ;;  %2149 = vmatprep.mubr.f32.mxu0 %v2583_v32 }
  0x35   :  { %2175 = vmatprep.mubr.f32.mxu1 %v206_v40 }
  0x37   :  { %2150 = vmatmul.mubr.f32.gmra.mxu0 %v2586_v33 }
  0x38   :  { %2176 = vmatmul.mubr.f32.gmra.mxu1 %v216_v41  ;;  %2152 = vmatprep.mubr.f32.mxu0 %v2604_v42 }
  0x39   :  { %2178 = vmatprep.mubr.f32.mxu1 %v226_v53 }
  0x3b   :  { %2153 = vmatmul.mubr.f32.gmra.mxu0 %v2654_v7 }
  0x3c   :  { %2179 = vmatmul.mubr.f32.gmra.mxu1 %v236_v20  ;;  %2155 = vmatprep.mubr.f32.mxu0 %v2666_v14 }
  0x3d   :  { %2181 = vmatprep.mubr.f32.mxu1 %v246_v37 }
  0x3f   :  { %2156 = vmatmul.mubr.f32.gmra.mxu0 %v2669_v16 }
  0x40   :  { %2182 = vmatmul.mubr.f32.gmra.mxu1 %v256_v39  ;;  %2158 = vmatprep.mubr.f32.mxu0 %v2675_v26 }
  0x41   :  { %2184 = vmatprep.mubr.f32.mxu1 %v266_v46 }
  0x43   :  { %2159 = vmatmul.mubr.f32.gmra.mxu0 %v2678_v35 }
  0x44   :  { %2185 = vmatmul.mubr.f32.gmra.mxu1 %v276_v54  ;;  %2161 = vmatprep.mubr.f32.mxu0 %v2695_v47 }
  0x45   :  { %2187 = vmatprep.mubr.f32.mxu1 %v286_v58 }
  0x47   :  { %2162 = vmatmul.mubr.f32.gmra.mxu0 %v2711_v55 }
  0x48   :  { %2188 = vmatmul.mubr.f32.gmra.mxu1 %v296_v1  ;;  %2164 = vmatprep.mubr.f32.mxu0 %v2719_v59 }
  0x49   :  { %2190 = vmatprep.mubr.f32.mxu1 %v306_v6 }
  0x4b   :  { %2165 = vmatmul.mubr.f32.gmra.mxu0 %v315_v13 }
  0x4c   :  { %2191 = vmatmul.mubr.f32.gmra.mxu1 %v316_v44  ;;  %2195 = vmatprep.mubr.f32.mxu0 %v2538_v10 }
  0x4d   :  { %2221 = vmatprep.mubr.f32.mxu1 %v2538_v10  ;;  %v2825_v10 = vld [vmem:[%s3303_s2] ss:$0 sm:$0xff] }
  0x4f   :  { %2196 = vmatmul.mubr.f32.vlgmr.msra.gmra.mxu0 %v2540_v11 }
  0x50   :  { %2222 = vmatmul.mubr.f32.vlgmr.msra.gmra.mxu1 %v2540_v11  ;;  %2198 = vmatprep.mubr.f32.mxu0 %v2549_v15 }
  0x51   :  { %2224 = vmatprep.mubr.f32.mxu1 %v2549_v15 }
  0x53   :  { %2199 = vmatmul.mubr.f32.gmra.mxu0 %v2563_v22 }
  0x54   :  { %2225 = vmatmul.mubr.f32.gmra.mxu1 %v2563_v22  ;;  %2201 = vmatprep.mubr.f32.mxu0 %v2569_v24 }
  0x55   :  { %2227 = vmatprep.mubr.f32.mxu1 %v2569_v24 }
  0x57   :  { %2202 = vmatmul.mubr.f32.gmra.mxu0 %v2571_v25 }
  0x58   :  { %2228 = vmatmul.mubr.f32.gmra.mxu1 %v2571_v25  ;;  %2204 = vmatprep.mubr.f32.mxu0 %v2588_v34 }
  0x59   :  { %2230 = vmatprep.mubr.f32.mxu1 %v2588_v34 }
  0x5b   :  { %2205 = vmatmul.mubr.f32.gmra.mxu0 %v2637_v63 }
  0x5c   :  { %2231 = vmatmul.mubr.f32.gmra.mxu1 %v2637_v63  ;;  %2207 = vmatprep.mubr.f32.mxu0 %v2646_v2 }
  0x5d   :  { %2233 = vmatprep.mubr.f32.mxu1 %v2646_v2 }
  0x5f   :  { %2208 = vmatmul.mubr.f32.gmra.mxu0 %v2648_v3 }
  0x60   :  { %2234 = vmatmul.mubr.f32.gmra.mxu1 %v2648_v3  ;;  %2210 = vmatprep.mubr.f32.mxu0 %v2656_v8 }
  0x61   :  { %2236 = vmatprep.mubr.f32.mxu1 %v2656_v8 }
  0x63   :  { %2211 = vmatmul.mubr.f32.gmra.mxu0 %v2658_v12 }
  0x64   :  { %2237 = vmatmul.mubr.f32.gmra.mxu1 %v2658_v12  ;;  %2213 = vmatprep.mubr.f32.mxu0 %v2680_v36 }
  0x65   :  { %2239 = vmatprep.mubr.f32.mxu1 %v2680_v36 }
  0x67   :  { %2214 = vmatmul.mubr.f32.gmra.mxu0 %v2686_v43 }
  0x68   :  { %2240 = vmatmul.mubr.f32.gmra.mxu1 %v2686_v43  ;;  %2216 = vmatprep.mubr.f32.mxu0 %v2701_v49 }
  0x69   :  { %2242 = vmatprep.mubr.f32.mxu1 %v2701_v49 }
  0x6b   :  { %2217 = vmatmul.mubr.f32.gmra.mxu0 %v2723_v61 }
  0x6c   :  { %2243 = vmatmul.mubr.f32.gmra.mxu1 %v2723_v61  ;;  %2277 = vmatprep.mubr.msk.f32.mxu0 %vm2483_vm2, %v2482_v9 }
  0x6d   :  { %2312 = vmatprep.mubr.msk.f32.mxu1 %vm2483_vm2, %v2482_v9 }
  0xcf   :  { %v2093_v11 = vpop.f32.mrf.mxu0 }
  0xd0   :  { %v181_v15 = vadd.f32 %v2093_v11, %v2825_v10  ;;  %v2119_v19 = vpop.f32.mrf.mxu1 }
  0xd1   :  { %v170_v21 = vpop.f32.mrf.mxu0 }
  0xd2   :  { %v403_v22 = vadd.f32 %v2119_v19, %v181_v15  ;;  %v171_v23 = vadd.f32 %v2825_v10, %v170_v21  ;;  %v396_v24 = vpop.f32.mrf.mxu1 }
  0xd3   :  { %v2096_v25 = vpop.f32.mrf.mxu0 }
  0xd4   :  { %v397_v27 = vadd.f32 %v396_v24, %v171_v23  ;;  %v201_v28 = vadd.f32 %v2096_v25, %v2825_v10  ;;  %v2122_v29 = vpop.f32.mrf.mxu1 }
  0xd5   :  { %v190_v30 = vpop.f32.mrf.mxu0 }
  0xd6   :  { %v415_v31 = vadd.f32 %v2122_v29, %v201_v28  ;;  %v191_v32 = vadd.f32 %v2825_v10, %v190_v30  ;;  %v408_v33 = vpop.f32.mrf.mxu1 }
  0xd7   :  { %v2099_v34 = vpop.f32.mrf.mxu0 }
  0xd8   :  { %v409_v38 = vadd.f32 %v408_v33, %v191_v32  ;;  %v221_v40 = vadd.f32 %v2099_v34, %v2825_v10  ;;  %v2125_v41 = vpop.f32.mrf.mxu1 }
  0xd9   :  { %v210_v42 = vpop.f32.mrf.mxu0 }
  0xda   :  { %v427_v53 = vadd.f32 %v2125_v41, %v221_v40  ;;  %v211_v63 = vadd.f32 %v2825_v10, %v210_v42  ;;  %v420_v2 = vpop.f32.mrf.mxu1 }
  0xdb   :  { %v2102_v3 = vpop.f32.mrf.mxu0 }
  0xdc   :  { %v421_v7 = vadd.f32 %v420_v2, %v211_v63  ;;  %v241_v8 = vadd.f32 %v2102_v3, %v2825_v10  ;;  %v2128_v12 = vpop.f32.mrf.mxu1 }
  0xdd   :  { %v230_v14 = vpop.f32.mrf.mxu0 }
  0xde   :  { %v439_v16 = vadd.f32 %v2128_v12, %v241_v8  ;;  %v231_v20 = vadd.f32 %v2825_v10, %v230_v14  ;;  %v432_v26 = vpop.f32.mrf.mxu1 }
  0xdf   :  { %v2105_v35 = vpop.f32.mrf.mxu0 }
  0xe0   :  { %v433_v36 = vadd.f32 %v432_v26, %v231_v20  ;;  %v261_v37 = vadd.f32 %v2105_v35, %v2825_v10  ;;  %v2131_v39 = vpop.f32.mrf.mxu1 }
  0xe1   :  { %v250_v43 = vpop.f32.mrf.mxu0 }
  0xe2   :  { %v451_v46 = vadd.f32 %v2131_v39, %v261_v37  ;;  %v251_v47 = vadd.f32 %v2825_v10, %v250_v43  ;;  %v444_v49 = vpop.f32.mrf.mxu1 }
  0xe3   :  { %v2108_v54 = vpop.f32.mrf.mxu0 }
  0xe4   :  { %v445_v55 = vadd.f32 %v444_v49, %v251_v47  ;;  %v281_v57 = vadd.f32 %v2108_v54, %v2825_v10  ;;  %v2134_v58 = vpop.f32.mrf.mxu1 }
  0xe5   :  { %v270_v59 = vpop.f32.mrf.mxu0 }
  0xe6   :  { %v2838_v60 = vadd.f32 %v2134_v58, %v281_v57  ;;  %v271_v61 = vadd.f32 %v2825_v10, %v270_v59  ;;  %v456_v62 = vpop.f32.mrf.mxu1 }
  0xe7   :  { %v2111_v0 = vpop.f32.mrf.mxu0 }
  0xe8   :  { %v2841_v1 = vadd.f32 %v456_v62, %v271_v61  ;;  %v301_v4 = vadd.f32 %v2111_v0, %v2825_v10  ;;  %v2137_v5 = vpop.f32.mrf.mxu1 }
  0xe9   :  { %v290_v6 = vpop.f32.mrf.mxu0 }
  0xea   :  { %v2844_v13 = vadd.f32 %v2137_v5, %v301_v4  ;;  %v291_v17 = vadd.f32 %v2825_v10, %v290_v6  ;;  %v468_v18 = vpop.f32.mrf.mxu1 }
  0xeb   :  { %v2847_v44 = vpop.f32.mrf.mxu0 }
  0xec   :  { %v2849_v45 = vadd.f32 %v468_v18, %v291_v17  ;;  %v2851_v48 = vpop.f32.mrf.mxu1 }
  0xed   :  { %v2853_v50 = vpop.f32.mrf.mxu0 }
  0xee   :  { %v2855_v51 = vpop.f32.mrf.mxu1 }
  0xef   :  { %v2145_v52 = vpop.f32.mrf.mxu0 }
  0xf0   :  { %v568_v56 = vadd.f32 %v2145_v52, %v403_v22  ;;  %v2171_v11 = vpop.f32.mrf.mxu1 }
  0xf1   :  { %v560_v15 = vpop.f32.mrf.mxu0 }
  0xf2   :  { %v748_v19 = vadd.f32 %v2171_v11, %v568_v56  ;;  %v561_v21 = vadd.f32 %v560_v15, %v397_v27  ;;  %v739_v23 = vpop.f32.mrf.mxu1 }
  0xf3   :  { %v2148_v24 = vpop.f32.mrf.mxu0 }
  0xf4   :  { %v740_v25 = vadd.f32 %v739_v23, %v561_v21  ;;  %v582_v28 = vadd.f32 %v2148_v24, %v415_v31  ;;  %v2174_v29 = vpop.f32.mrf.mxu1 }
  0xf5   :  { %v574_v30 = vpop.f32.mrf.mxu0 }
  0xf6   :  { %v764_v32 = vadd.f32 %v2174_v29, %v582_v28  ;;  %v575_v33 = vadd.f32 %v574_v30, %v409_v38  ;;  %v755_v22 = vpop.f32.mrf.mxu1 }
  0xf7   :  { %v2151_v34 = vpop.f32.mrf.mxu0 }
  0xf8   :  { %v756_v40 = vadd.f32 %v755_v22, %v575_v33  ;;  %v596_v41 = vadd.f32 %v2151_v34, %v427_v53  ;;  %v2177_v27 = vpop.f32.mrf.mxu1 }
  0xf9   :  { %v588_v42 = vpop.f32.mrf.mxu0 }
  0xfa   :  { %v2861_v63 = vadd.f32 %v2177_v27, %v596_v41  ;;  %v589_v2 = vadd.f32 %v588_v42, %v421_v7  ;;  %v771_v3 = vpop.f32.mrf.mxu1 }
  0xfb   :  { %v2154_v8 = vpop.f32.mrf.mxu0 }
  0xfc   :  { %v2863_v12 = vadd.f32 %v771_v3, %v589_v2  ;;  %v610_v14 = vadd.f32 %v2154_v8, %v439_v16  ;;  %v2180_v20 = vpop.f32.mrf.mxu1 }
  0xfd   :  { %v602_v31 = vpop.f32.mrf.mxu0 }
  0xfe   :  { %v2865_v26 = vadd.f32 %v2180_v20, %v610_v14  ;;  %v603_v35 = vadd.f32 %v602_v31, %v433_v36  ;;  %v787_v38 = vpop.f32.mrf.mxu1  ;;  %v321_v14 = vadd.f32 %v2847_v44, %v2825_v10 }
  0xff   :  { %v2157_v37 = vpop.f32.mrf.mxu0 }
 0x100   :  { %v2867_v39 = vadd.f32 %v787_v38, %v603_v35  ;;  %v624_v53 = vadd.f32 %v2157_v37, %v451_v46  ;;  %v2183_v43 = vpop.f32.mrf.mxu1  ;;  %v311_v35 = vadd.f32 %v2825_v10, %v2853_v50 }
 0x101   :  { %v616_v47 = vpop.f32.mrf.mxu0 }
 0x102   :  { %v2869_v49 = vadd.f32 %v2183_v43, %v624_v53  ;;  %v617_v7 = vadd.f32 %v616_v47, %v445_v55  ;;  %v803_v54 = vpop.f32.mrf.mxu1  ;;  %v487_v43 = vadd.f32 %v2851_v48, %v321_v14  ;;  %v481_v44 = vadd.f32 %v2855_v51, %v311_v35 }
 0x103   :  { %v2160_v57 = vpop.f32.mrf.mxu0 }
 0x104   :  { %v2871_v58 = vadd.f32 %v803_v54, %v617_v7  ;;  %v2186_v16 = vpop.f32.mrf.mxu1  ;;  %v638_v7 = vadd.f32 %v2160_v57, %v2838_v60 }
 0x105   :  { %v630_v59 = vpop.f32.mrf.mxu0 }
 0x106   :  { %v2873_v61 = vpop.f32.mrf.mxu1 }
 0x107   :  { %v2163_v62 = vpop.f32.mrf.mxu0 }
 0x108   :  { %v2189_v36 = vpop.f32.mrf.mxu1  ;;  %v652_v37 = vadd.f32 %v2163_v62, %v2844_v13  ;;  %v631_v13 = vadd.f32 %v630_v59, %v2841_v1 }
 0x109   :  { %v644_v0 = vpop.f32.mrf.mxu0 }
 0x10a   :  { %v835_v4 = vpop.f32.mrf.mxu1  ;;  %v645_v54 = vadd.f32 %v644_v0, %v2849_v45 }
 0x10b   :  { %v2166_v5 = vpop.f32.mrf.mxu0 }
 0x10c   :  { %v2192_v6 = vpop.f32.mrf.mxu1  ;;  %v836_v62 = vadd.f32 %v835_v4, %v645_v54 }
 0x10d   :  { %v658_v46 = vpop.f32.mrf.mxu0 }
 0x10e   :  { %v851_v17 = vpop.f32.mrf.mxu1  ;;  %v659_v10 = vadd.f32 %v658_v46, %v481_v44 }
 0x10f   :  { %v2197_v18 = vpop.f32.mrf.mxu0 }
 0x110   :  { %v940_v52 = vadd.f32 %v2197_v18, %v748_v19  ;;  %v2223_v56 = vpop.f32.mrf.mxu1 }
 0x111   :  { %v933_v55 = vpop.f32.mrf.mxu0 }
 0x112   :  { %v2875_v11 = vadd.f32 %v2223_v56, %v940_v52  ;;  %v934_v15 = vadd.f32 %v933_v55, %v740_v25  ;;  %v1095_v21 = vpop.f32.mrf.mxu1  ;;  %v666_v52 = vadd.f32 %v2166_v5, %v487_v43  ;;  %v844_v55 = vadd.f32 %v2189_v36, %v652_v37 }
 0x113   :  { %v2200_v23 = vpop.f32.mrf.mxu0  ;;  %v820_v36 = vadd.f32 %v2873_v61, %v631_v13 }
 0x114   :  { %v2877_v24 = vadd.f32 %v1095_v21, %v934_v15  ;;  %v952_v28 = vadd.f32 %v2200_v23, %v764_v32  ;;  %v2226_v29 = vpop.f32.mrf.mxu1  ;;  %v828_v21 = vadd.f32 %v2186_v16, %v638_v7 }
 0x115   :  { %v945_v30 = vpop.f32.mrf.mxu0 }
 0x116   :  { %v2879_v33 = vadd.f32 %v2226_v29, %v952_v28  ;;  %v946_v22 = vadd.f32 %v945_v30, %v756_v40  ;;  %v1107_v34 = vpop.f32.mrf.mxu1  ;;  %v860_v28 = vadd.f32 %v2192_v6, %v666_v52  ;;  %v852_v30 = vadd.f32 %v851_v17, %v659_v10 }
 0x117   :  { %v2881_v41 = vpop.f32.mrf.mxu0 }
 0x118   :  { %v2883_v27 = vadd.f32 %v1107_v34, %v946_v22  ;;  %v2885_v19 = vpop.f32.mrf.mxu1 }
 0x119   :  { %v2887_v42 = vpop.f32.mrf.mxu0 }
 0x11a   :  { %v2889_v25 = vpop.f32.mrf.mxu1 }
 0x11b   :  { %v2891_v2 = vpop.f32.mrf.mxu0 }
 0x11c   :  { %v2893_v3 = vpop.f32.mrf.mxu1 }
 0x11d   :  { %v2895_v32 = vpop.f32.mrf.mxu0 }
 0x11e   :  { %v2897_v8 = vpop.f32.mrf.mxu1 }
 0x11f   :  { %v2209_v40 = vpop.f32.mrf.mxu0 }
 0x120   :  { %v2235_v20 = vpop.f32.mrf.mxu1  ;;  %v988_v17 = vadd.f32 %v2209_v40, %v2869_v49 }
 0x121   :  { %v981_v31 = vpop.f32.mrf.mxu0 }
 0x122   :  { %v2903_v38 = vpop.f32.mrf.mxu1 }
 0x123   :  { %v2212_v53 = vpop.f32.mrf.mxu0 }
 0x124   :  { %v2238_v47 = vpop.f32.mrf.mxu1  ;;  %v1000_v60 = vadd.f32 %v2212_v53, %v828_v21 }
 0x125   :  { %v993_v18 = vpop.f32.mrf.mxu0 }
 0x126   :  { %v1155_v56 = vpop.f32.mrf.mxu1  ;;  %v1162_v59 = vadd.f32 %v2238_v47, %v1000_v60  ;;  %v994_v4 = vadd.f32 %v993_v18, %v820_v36  ;;  %v1150_v18 = vadd.f32 %v2235_v20, %v988_v17 }
 0x127   :  { %v2215_v15 = vpop.f32.mrf.mxu0 }
 0x128   :  { %v2241_v50 = vpop.f32.mrf.mxu1  ;;  %v1012_v23 = vadd.f32 %v2215_v15, %v844_v55  ;;  %v1200_v54 = vmul.f32 0.1, %v1162_v59  ;;  %v1156_v44 = vadd.f32 %v1155_v56, %v994_v4 }
 0x129   :  { %v1005_v48 = vpop.f32.mrf.mxu0 }
 0x12a   :  { %v1167_v29 = vpop.f32.mrf.mxu1  ;;  %v1174_v57 = vadd.f32 %v2241_v50, %v1012_v23  ;;  %v1006_v45 = vadd.f32 %v1005_v48, %v836_v62  ;;  %v982_v50 = vadd.f32 %v981_v31, %v2871_v58  ;;  %v1216_v21 = vmax.f32 %v1162_v59, %v1200_v54 }
 0x12b   :  { %v2218_v0 = vpop.f32.mrf.mxu0  ;;  %v1199_v49 = vmul.f32 0.1, %v1156_v44  ;;  %v976_v23 = vadd.f32 %v2891_v2, %v2865_v26  ;;  %v1198_v31 = vmul.f32 0.1, %v1150_v18 }
 0x12c   :  { %v1024_v51 = vadd.f32 %v2218_v0, %v860_v28  ;;  %v2244_v5 = vpop.f32.mrf.mxu1  ;;  %v1202_v22 = vmul.f32 0.1, %v1174_v57  ;;  %v1168_v46 = vadd.f32 %v1167_v29, %v1006_v45  ;;  %v1144_v48 = vadd.f32 %v2903_v38, %v982_v50  ;;  %v1222_v38 = vld [vmem:[%s3305_s4] sm:$0xff] }
 0x12d   :  { %v1017_v34 = vpop.f32.mrf.mxu0  ;;  %v2942_v28 = vand.u32 4294901760, %v1216_v21  ;;  %v1215_v29 = vmax.f32 %v1156_v44, %v1199_v49  ;;  %v970_v45 = vadd.f32 %v2895_v32, %v2867_v39  ;;  %v1138_v0 = vadd.f32 %v2893_v3, %v976_v23 }
 0x12e   :  { %v1186_v16 = vadd.f32 %v2244_v5, %v1024_v51  ;;  %v1018_v14 = vadd.f32 %v1017_v34, %v852_v30  ;;  %v1179_v1 = vpop.f32.mrf.mxu1  ;;  %v1218_v35 = vmax.f32 %v1174_v57, %v1202_v22  ;;  %v1201_v6 = vmul.f32 0.1, %v1168_v46 }
 0x12f   :  { %v1214_v30 = vmax.f32 %v1150_v18, %v1198_v31  ;;  %v1197_v51 = vmul.f32 0.1, %v1144_v48  ;;  %v2960_v5 = vsub.f32 %v1216_v21, %v2942_v28  ;;  %v2964_v36 = vand.u32 4294901760, %v1215_v29 }
 0x130   :  { %v1204_v37 = vmul.f32 0.1, %v1186_v16  ;;  %v1180_v53 = vadd.f32 %v1179_v1, %v1018_v14  ;;  %v2913_v52 = vand.u32 4294901760, %v1218_v35  ;;  %v1217_v61 = vmax.f32 %v1168_v46, %v1201_v6 }
 0x131   :  { %v2484_v46 = vmov 0   ;;  %v964_v3 = vadd.f32 %v2881_v41, %v2861_v63  ;;  %v1196_v34 = vmul.f32 0.1, %v1138_v0  ;;  %v2974_v14 = vand.u32 4294901760, %v1214_v30 }
 0x132   :  { %v1220_v43 = vmax.f32 %v1186_v16, %v1204_v37  ;;  %v1203_v7 = vmul.f32 0.1, %v1180_v53  ;;  %v2926_v40 = vsub.f32 %v1218_v35, %v2913_v52  ;;  %v2928_v56 = vand.u32 4294901760, %v1217_v61  ;;  %2459 = vset.pattern.permute.xlu0 %v2484_v46 }
 0x133   :  { %1225 = vperm.xlu0 %2459, %v1222_v38   ;;  %v1132_v16 = vadd.f32 %v2897_v8, %v970_v45  ;;  %v1213_v1 = vmax.f32 %v1144_v48, %v1197_v51  ;;  %v1350_v59 = vand.u32 4294901760, %v2960_v5  ;;  %v2980_v4 = vsub.f32 %v1215_v29, %v2964_v36 }
 0x134   :  { %v2915_v55 = vand.u32 4294901760, %v1220_v43  ;;  %v1219_v15 = vmax.f32 %v1180_v53, %v1203_v7  ;;  %v1336_v60 = vand.u32 4294901760, %v2926_v40  ;;  %v2947_v26 = vsub.f32 %v1217_v61, %v2928_v56 }
 0x135   :  { %v1126_v41 = vadd.f32 %v2885_v19, %v964_v3  ;;  %v958_v8 = vadd.f32 %v2887_v42, %v2863_v12  ;;  %v1212_v6 = vmax.f32 %v1138_v0, %v1196_v34  ;;  %v1195_v37 = vmul.f32 0.1, %v1132_v16 }
 0x136   :  { %v2918_v10 = vsub.f32 %v1220_v43, %v2915_v55  ;;  %v2920_v47 = vand.u32 4294901760, %v1219_v15  ;;  %2246 = vmatpush3.xpose.msra.mxu0 %v2915_v55  ;;  %v1343_v39 = vand.u32 4294901760, %v2947_v26  ;;  %v1337_v22 = vsub.f32 %v2926_v40, %v1336_v60 }
 0x137   :  { %2247 = vmatprep.subr.mxu0 %v2482_v9  ;;  %v2990_v53 = vsub.f32 %v1214_v30, %v2974_v14  ;;  %v2994_v43 = vand.u32 4294901760, %v1213_v1  ;;  %v1357_v7 = vand.u32 4294901760, %v2980_v4  ;;  %v1351_v17 = vsub.f32 %v2960_v5, %v1350_v59 }
 0x138   :  { %v1322_v13 = vand.u32 4294901760, %v2918_v10  ;;  %v2932_v62 = vsub.f32 %v1219_v15, %v2920_v47  ;;  %v1338_v35 = vand.u32 4294901760, %v1337_v22  ;;  %v1344_v63 = vsub.f32 %v2947_v26, %v1343_v39 }
 0x139   :  { %v1194_v12 = vmul.f32 0.1, %v1126_v41  ;;  %v1120_v42 = vadd.f32 %v2889_v25, %v958_v8  ;;  %v3002_v54 = vand.u32 4294901760, %v1212_v6  ;;  %v1211_v44 = vmax.f32 %v1132_v16, %v1195_v37 }
 0x13a   :  { %v1329_v20 = vand.u32 4294901760, %v2932_v62  ;;  %2248 = vmatpush3.xpose.msra.mxu0 %v2920_v47  ;;  %v1323_v58 = vsub.f32 %v2918_v10, %v1322_v13  ;;  %v1345_v19 = vand.u32 4294901760, %v1344_v63  ;;  %v1364_v61 = vand.u32 4294901760, %v2990_v53 }
 0x13b   :  { %2249 = vmatprep.subr.mxu0 %v2482_v9  ;;  %v3008_v15 = vsub.f32 %v1213_v1, %v2994_v43  ;;  %v1352_v18 = vand.u32 4294901760, %v1351_v17  ;;  %v1358_v50 = vsub.f32 %v2980_v4, %v1357_v7  ;;  %v1210_v25 = vmax.f32 %v1126_v41, %v1194_v12 }
 0x13c   :  { %v1324_v2 = vand.u32 4294901760, %v1323_v58  ;;  %v1330_v57 = vsub.f32 %v2932_v62, %v1329_v20  ;;  %v1193_v21 = vmul.f32 0.1, %v1120_v42  ;;  %v3014_v49 = vand.u32 4294901760, %v1211_v44 }
 0x13d   :  { %v3019_v23 = vsub.f32 %v1212_v6, %v3002_v54  ;;  %v1371_v58 = vand.u32 4294901760, %v3008_v15  ;;  %v1359_v31 = vand.u32 4294901760, %v1358_v50  ;;  %v1365_v48 = vsub.f32 %v2990_v53, %v1364_v61 }
 0x13e   :  { %2250 = vmatpush3.xpose.msra.mxu0 %v2913_v52  ;;  %2281 = vmatpush3.xpose.msra.mxu1 %v1324_v2  ;;  %v1331_v32 = vand.u32 4294901760, %v1330_v57  ;;  %v1192_v29 = vmul.f32 0.1, %v2879_v33  ;;  %v3027_v2 = vand.u32 4294901760, %v1210_v25  ;;  %v1209_v57 = vmax.f32 %v1120_v42, %v1193_v21 }
 0x13f   :  { %2251 = vmatprep.subr.mxu0 %v2482_v9  ;;  %2282 = vmatprep.subr.mxu1 %v2482_v9  ;;  %v1378_v45 = vand.u32 4294901760, %v3019_v23  ;;  %v3033_v38 = vsub.f32 %v1211_v44, %v3014_v49  ;;  %v1366_v0 = vand.u32 4294901760, %v1365_v48  ;;  %v1372_v30 = vsub.f32 %v3008_v15, %v1371_v58 }
 0x140   :  { %v1208_v51 = vmax.f32 %v2879_v33, %v1192_v29  ;;  %v3042_v22 = vsub.f32 %v1210_v25, %v3027_v2  ;;  %v3046_v46 = vand.u32 4294901760, %v1209_v57  ;;  %v1190_v33 = vmul.f32 0.1, %v2875_v11 }
 0x141   :  { %v1385_v3 = vand.u32 4294901760, %v3033_v38  ;;  %v1373_v34 = vand.u32 4294901760, %v1372_v30  ;;  %v1379_v16 = vsub.f32 %v3019_v23, %v1378_v45 }
 0x142   :  { %2252 = vmatpush3.xpose.msra.mxu0 %v2928_v56  ;;  %2283 = vmatpush3.xpose.msra.mxu1 %v1331_v32  ;;  %v1191_v32 = vmul.f32 0.1, %v2883_v27  ;;  %v3054_v1 = vand.u32 4294901760, %v1208_v51  ;;  %v1392_v63 = vand.u32 4294901760, %v3042_v22  ;;  %v3061_v41 = vsub.f32 %v1209_v57, %v3046_v46 }
 0x143   :  { %2253 = vmatprep.subr.mxu0 %v2482_v9  ;;  %2284 = vmatprep.subr.mxu1 %v2482_v9  ;;  %v1380_v8 = vand.u32 4294901760, %v1379_v16  ;;  %v1386_v6 = vsub.f32 %v3033_v38, %v1385_v3  ;;  %v1206_v37 = vmax.f32 %v2875_v11, %v1190_v33 }
 0x144   :  { %v3073_v17 = vsub.f32 %v1208_v51, %v3054_v1  ;;  %v1399_v42 = vand.u32 4294901760, %v3061_v41 }
 0x145   :  { %v1387_v44 = vand.u32 4294901760, %v1386_v6  ;;  %v3086_v11 = vand.u32 4294901760, %v1206_v37 }
 0x146   :  { %2254 = vmatpush3.xpose.msra.mxu0 %v2942_v28  ;;  %2285 = vmatpush3.xpose.msra.mxu1 %v1338_v35  ;;  %v1207_v35 = vmax.f32 %v2883_v27, %v1191_v32  ;;  %v1221_v27 = vld [vmem:[%s3304_s3] sm:$0xff]  ;;  %v1406_v21 = vand.u32 4294901760, %v3073_v17  ;;  %v1400_v29 = vsub.f32 %v3061_v41, %v1399_v42  ;;  %s2485_s3 = smov [#allocation2]  }
 0x147   :  { %2255 = vmatprep.subr.mxu0 %v2482_v9  ;;  %2286 = vmatprep.subr.mxu1 %v2482_v9  ;;  %v3083_v50 = vand.u32 4294901760, %v1221_v27  ;;  %s1876_s28 = sshll.u32 %s2485_s3, 4  ;;  %s1877_s28 = int_to_ptr.vmem [resolvable:$true] %s1876_s28 }
 0x148   :  { %v3077_v12 = vand.u32 4294901760, %v1207_v35  ;;  %v1401_v51 = vand.u32 4294901760, %v1400_v29  ;;  %v1407_v32 = vsub.f32 %v3073_v17, %v1406_v21  ;;  %s2460_s29 = scalar_lea.vmem %s1877_s28, 128  ;;  %p2465_p1 = scmp.lt.s32.totalorder %s1877_s28, %s1877_s28 }
 0x149   :  { %v3099_v57 = vsub.f32 %v1221_v27, %v3083_v50  ;;  %p2461_p0 = scmp.ne.s32.totalorder %s1877_s28, %s2460_s29  ;;  %p2466_p2 = scmp.lt.s32.totalorder %s2460_s29, %s2460_s29 }
 0x14a   :  { %2256 = vmatpush3.xpose.msra.mxu0 %v2964_v36  ;;  %2287 = vmatpush3.xpose.msra.mxu1 %v1345_v19  ;;  %v1189_v19 = vmul.f32 0.1, %v2877_v24 }
 0x14b   :  { %2257 = vmatprep.subr.mxu0 %v2482_v9  ;;  %2288 = vmatprep.subr.mxu1 %v2482_v9  ;;  %p2467_p3 = por %p2466_p2, %p2465_p1 }
 0x14c   :  { %v1205_v25 = vmax.f32 %v2877_v24, %v1189_v19  ;;  %v3103_v24 = vsub.f32 %v1206_v37, %v3086_v11 }
 0x14d   :  { %p2468_p4 = pnand %p2467_p3, %p2461_p0 }
 0x14e   :  { %2258 = vmatpush3.xpose.msra.mxu0 %v2974_v14  ;;  %2289 = vmatpush3.xpose.msra.mxu1 %v1352_v18  ;;  %v1393_v18 = vsub.f32 %v3042_v22, %v1392_v63  ;;  %v1420_v16 = vand.u32 4294901760, %v3103_v24 }
 0x14f   :  { %2259 = vmatprep.subr.mxu0 %v2482_v9  ;;  %2290 = vmatprep.subr.mxu1 %v2482_v9 }
 0x150   :  { %v1394_v48 = vand.u32 4294901760, %v1393_v18  ;;  %v1421_v19 = vsub.f32 %v3103_v24, %v1420_v16 }
 0x152   :  { %2260 = vmatpush3.xpose.msra.mxu0 %v2994_v43  ;;  %2291 = vmatpush3.xpose.msra.mxu1 %v1359_v31  ;;  %v3093_v31 = vsub.f32 %v1207_v35, %v3077_v12  ;;  %v1408_v35 = vand.u32 4294901760, %v1407_v32  ;;  %v1422_v18 = vand.u32 4294901760, %v1421_v19 }
 0x153   :  { %2261 = vmatprep.subr.mxu0 %v2482_v9  ;;  %2292 = vmatprep.subr.mxu1 %v2482_v9 }
 0x154   :  { %v1413_v30 = vand.u32 4294901760, %v3093_v31 }
 0x156   :  { %2262 = vmatpush3.xpose.msra.mxu0 %v3002_v54  ;;  %2293 = vmatpush3.xpose.msra.mxu1 %v1366_v0  ;;  %v3107_v0 = vand.u32 4294901760, %v1205_v25 }
 0x157   :  { %2263 = vmatprep.subr.mxu0 %v2482_v9  ;;  %2294 = vmatprep.subr.mxu1 %v2482_v9 }
 0x158   :  { %v3119_v33 = vsub.f32 %v1205_v25, %v3107_v0 }
 0x15a   :  { %2264 = vmatpush3.xpose.msra.mxu0 %v3014_v49  ;;  %2295 = vmatpush3.xpose.msra.mxu1 %v1373_v34  ;;  %v1311_v34 = vand.u32 4294901760, %v3099_v57  ;;  %v1427_v27 = vand.u32 4294901760, %v3119_v33 }
 0x15b   :  { %2265 = vmatprep.subr.mxu0 %v2482_v9  ;;  %2296 = vmatprep.subr.mxu1 %v2482_v9 }
 0x15c   :  { %v1312_v6 = vsub.f32 %v3099_v57, %v1311_v34  ;;  %v1428_v25 = vsub.f32 %v3119_v33, %v1427_v27 }
 0x15e   :  { %2266 = vmatpush3.xpose.msra.mxu0 %v3027_v2  ;;  %2297 = vmatpush3.xpose.msra.mxu1 %v1380_v8  ;;  %v1414_v8 = vsub.f32 %v3093_v31, %v1413_v30 }
 0x15f   :  { %2267 = vmatprep.subr.mxu0 %v2482_v9  ;;  %2298 = vmatprep.subr.mxu1 %v2482_v9 }
 0x160   :  { %v1415_v37 = vand.u32 4294901760, %v1414_v8 }
 0x162   :  { %2268 = vmatpush3.xpose.msra.mxu0 %v3046_v46  ;;  %2299 = vmatpush3.xpose.msra.mxu1 %v1387_v44  ;;  %v1313_v44 = vand.u32 4294901760, %v1312_v6 }
 0x163   :  { %2269 = vmatprep.subr.mxu0 %v2482_v9  ;;  %2300 = vmatprep.subr.mxu1 %v2482_v9 }
 0x166   :  { %2270 = vmatpush3.xpose.msra.mxu0 %v3054_v1  ;;  %2301 = vmatpush3.xpose.msra.mxu1 %v1394_v48  ;;  %v1429_v48 = vand.u32 4294901760, %v1428_v25 }
 0x167   :  { %2271 = vmatprep.subr.mxu0 %v2482_v9  ;;  %2302 = vmatprep.subr.mxu1 %v2482_v9 }
 0x16a   :  { %2272 = vmatpush3.xpose.msra.mxu0 %v3077_v12  ;;  %2303 = vmatpush3.xpose.msra.mxu1 %v1401_v51 }
 0x16b   :  { %2273 = vmatprep.subr.mxu0 %v2482_v9  ;;  %2304 = vmatprep.subr.mxu1 %v2482_v9 }
 0x16e   :  { %2274 = vmatpush3.xpose.msra.mxu0 %v3086_v11  ;;  %2305 = vmatpush3.xpose.msra.mxu1 %v1408_v35 }
 0x16f   :  { %2275 = vmatprep.subr.mxu0 %v2482_v9  ;;  %2306 = vmatprep.subr.mxu1 %v2482_v9 }
 0x172   :  { %2276 = vmatpush3.xpose.msra.mxu0 %v3107_v0  ;;  %2307 = vmatpush3.xpose.msra.mxu1 %v1415_v37 }
 0x173   :  { %2308 = vmatprep.subr.mxu1 %v2482_v9  ;;  %2315 = vmatprep.subr.mxu0 %v2482_v9 }
 0x175   :  { %2278 = vmatmul.mubr.f32.vlgmr.msra.gmra.mxu0 %v1313_v44 }
 0x176   :  { %2309 = vmatpush3.xpose.msra.mxu1 %v1422_v18  ;;  %2316 = vmatpush3.xpose.msra.mxu0 %v2918_v10 }
 0x177   :  { %2310 = vmatprep.subr.mxu1 %v2482_v9  ;;  %2317 = vmatprep.subr.mxu0 %v2482_v9 }
 0x178   :  { %2347 = vmatprep.mubr.msk.f32.mxu0 %vm2483_vm2, %v2482_v9 }
 0x17a   :  { %2311 = vmatpush3.xpose.msra.mxu1 %v1429_v48  ;;  %2318 = vmatpush3.xpose.msra.mxu0 %v2932_v62 }
 0x17b   :  { %2319 = vmatprep.subr.mxu0 %v2482_v9  ;;  %2350 = vmatprep.subr.mxu1 %v2482_v9 }
 0x17d   :  { %2313 = vmatmul.mubr.f32.vlgmr.msra.gmra.mxu1 %v3083_v50 }
 0x17e   :  { %2320 = vmatpush3.xpose.msra.mxu0 %v2926_v40  ;;  %2351 = vmatpush3.xpose.msra.mxu1 %v2915_v55 }
 0x17f   :  { %2321 = vmatprep.subr.mxu0 %v2482_v9  ;;  %2352 = vmatprep.subr.mxu1 %v2482_v9 }
 0x180   :  { %2382 = vmatprep.mubr.msk.f32.mxu1 %vm2483_vm2, %v2482_v9 }
 0x182   :  { %2322 = vmatpush3.xpose.msra.mxu0 %v2947_v26  ;;  %2353 = vmatpush3.xpose.msra.mxu1 %v2920_v47 }
 0x183   :  { %2323 = vmatprep.subr.mxu0 %v2482_v9  ;;  %2354 = vmatprep.subr.mxu1 %v2482_v9 }
 0x186   :  { %2324 = vmatpush3.xpose.msra.mxu0 %v2960_v5  ;;  %2355 = vmatpush3.xpose.msra.mxu1 %v2913_v52 }
 0x187   :  { %2325 = vmatprep.subr.mxu0 %v2482_v9  ;;  %2356 = vmatprep.subr.mxu1 %v2482_v9 }
 0x18a   :  { %2326 = vmatpush3.xpose.msra.mxu0 %v2980_v4  ;;  %2357 = vmatpush3.xpose.msra.mxu1 %v2928_v56 }
 0x18b   :  { %2327 = vmatprep.subr.mxu0 %v2482_v9  ;;  %2358 = vmatprep.subr.mxu1 %v2482_v9 }
 0x18e   :  { %2328 = vmatpush3.xpose.msra.mxu0 %v2990_v53  ;;  %2359 = vmatpush3.xpose.msra.mxu1 %v2942_v28 }
 0x18f   :  { %2329 = vmatprep.subr.mxu0 %v2482_v9  ;;  %2360 = vmatprep.subr.mxu1 %v2482_v9 }
 0x192   :  { %2330 = vmatpush3.xpose.msra.mxu0 %v3008_v15  ;;  %2361 = vmatpush3.xpose.msra.mxu1 %v2964_v36 }
 0x193   :  { %2331 = vmatprep.subr.mxu0 %v2482_v9  ;;  %2362 = vmatprep.subr.mxu1 %v2482_v9 }
 0x196   :  { %2332 = vmatpush3.xpose.msra.mxu0 %v3019_v23  ;;  %2363 = vmatpush3.xpose.msra.mxu1 %v2974_v14 }
 0x197   :  { %2333 = vmatprep.subr.mxu0 %v2482_v9  ;;  %2364 = vmatprep.subr.mxu1 %v2482_v9 }
 0x19a   :  { %2334 = vmatpush3.xpose.msra.mxu0 %v3033_v38  ;;  %2365 = vmatpush3.xpose.msra.mxu1 %v2994_v43 }
 0x19b   :  { %2335 = vmatprep.subr.mxu0 %v2482_v9  ;;  %2366 = vmatprep.subr.mxu1 %v2482_v9 }
 0x19e   :  { %2336 = vmatpush3.xpose.msra.mxu0 %v3042_v22  ;;  %2367 = vmatpush3.xpose.msra.mxu1 %v3002_v54 }
 0x19f   :  { %2337 = vmatprep.subr.mxu0 %v2482_v9  ;;  %2368 = vmatprep.subr.mxu1 %v2482_v9 }
 0x1a2   :  { %2338 = vmatpush3.xpose.msra.mxu0 %v3061_v41  ;;  %2369 = vmatpush3.xpose.msra.mxu1 %v3014_v49 }
 0x1a3   :  { %2339 = vmatprep.subr.mxu0 %v2482_v9  ;;  %2370 = vmatprep.subr.mxu1 %v2482_v9 }
 0x1a6   :  { %2340 = vmatpush3.xpose.msra.mxu0 %v3073_v17  ;;  %2371 = vmatpush3.xpose.msra.mxu1 %v3027_v2 }
 0x1a7   :  { %2341 = vmatprep.subr.mxu0 %v2482_v9  ;;  %2372 = vmatprep.subr.mxu1 %v2482_v9 }
 0x1aa   :  { %2342 = vmatpush3.xpose.msra.mxu0 %v3093_v31  ;;  %2373 = vmatpush3.xpose.msra.mxu1 %v3046_v46 }
 0x1ab   :  { %2343 = vmatprep.subr.mxu0 %v2482_v9  ;;  %2374 = vmatprep.subr.mxu1 %v2482_v9 }
 0x1ae   :  { %2344 = vmatpush3.xpose.msra.mxu0 %v3103_v24  ;;  %2375 = vmatpush3.xpose.msra.mxu1 %v3054_v1 }
 0x1af   :  { %2345 = vmatprep.subr.mxu0 %v2482_v9  ;;  %2376 = vmatprep.subr.mxu1 %v2482_v9 }
 0x1b2   :  { %2346 = vmatpush3.xpose.msra.mxu0 %v3119_v33  ;;  %2377 = vmatpush3.xpose.msra.mxu1 %v3077_v12 }
 0x1b3   :  { %2378 = vmatprep.subr.mxu1 %v2482_v9  ;;  %2385 = vmatprep.subr.mxu0 %v2482_v9 }
 0x1b5   :  { %2348 = vmatmul.mubr.f32.vlgmr.msra.gmra.mxu0 %v3099_v57 }
 0x1b6   :  { %2379 = vmatpush3.xpose.msra.mxu1 %v3086_v11  ;;  %2386 = vmatpush3.xpose.msra.mxu0 %v1322_v13 }
 0x1b7   :  { %2380 = vmatprep.subr.mxu1 %v2482_v9  ;;  %2387 = vmatprep.subr.mxu0 %v2482_v9 }
 0x1b8   :  { %2417 = vmatprep.mubr.msk.f32.mxu0 %vm2483_vm2, %v2482_v9 }
 0x1ba   :  { %2381 = vmatpush3.xpose.msra.mxu1 %v3107_v0  ;;  %2388 = vmatpush3.xpose.msra.mxu0 %v1329_v20 }
 0x1bb   :  { %2389 = vmatprep.subr.mxu0 %v2482_v9  ;;  %2420 = vmatprep.subr.mxu1 %v2482_v9 }
 0x1bd   :  { %2383 = vmatmul.mubr.f32.vlgmr.msra.gmra.mxu1 %v1311_v34 }
 0x1be   :  { %2390 = vmatpush3.xpose.msra.mxu0 %v1336_v60  ;;  %2421 = vmatpush3.xpose.msra.mxu1 %v2915_v55  ;;  %v1226_v55 = vpop.permute.xlu0 %1225 }
 0x1bf   :  { %2391 = vmatprep.subr.mxu0 %v2482_v9  ;;  %2422 = vmatprep.subr.mxu1 %v2482_v9 }
 0x1c0   :  { %2452 = vmatprep.mubr.msk.f32.mxu1 %vm2483_vm2, %v2482_v9 }
 0x1c2   :  { %2392 = vmatpush3.xpose.msra.mxu0 %v1343_v39  ;;  %2423 = vmatpush3.xpose.msra.mxu1 %v2920_v47 }
 0x1c3   :  { %2393 = vmatprep.subr.mxu0 %v2482_v9  ;;  %2424 = vmatprep.subr.mxu1 %v2482_v9 }
 0x1c6   :  { %2394 = vmatpush3.xpose.msra.mxu0 %v1350_v59  ;;  %2425 = vmatpush3.xpose.msra.mxu1 %v2913_v52 }
 0x1c7   :  { %2395 = vmatprep.subr.mxu0 %v2482_v9  ;;  %2426 = vmatprep.subr.mxu1 %v2482_v9 }
 0x1ca   :  { %2396 = vmatpush3.xpose.msra.mxu0 %v1357_v7  ;;  %2427 = vmatpush3.xpose.msra.mxu1 %v2928_v56 }
 0x1cb   :  { %2397 = vmatprep.subr.mxu0 %v2482_v9  ;;  %2428 = vmatprep.subr.mxu1 %v2482_v9 }
 0x1ce   :  { %2398 = vmatpush3.xpose.msra.mxu0 %v1364_v61  ;;  %2429 = vmatpush3.xpose.msra.mxu1 %v2942_v28 }
 0x1cf   :  { %2399 = vmatprep.subr.mxu0 %v2482_v9  ;;  %2430 = vmatprep.subr.mxu1 %v2482_v9 }
 0x1d2   :  { %2400 = vmatpush3.xpose.msra.mxu0 %v1371_v58  ;;  %2431 = vmatpush3.xpose.msra.mxu1 %v2964_v36 }
 0x1d3   :  { %2401 = vmatprep.subr.mxu0 %v2482_v9  ;;  %2432 = vmatprep.subr.mxu1 %v2482_v9 }
 0x1d6   :  { %2402 = vmatpush3.xpose.msra.mxu0 %v1378_v45  ;;  %2433 = vmatpush3.xpose.msra.mxu1 %v2974_v14 }
 0x1d7   :  { %2403 = vmatprep.subr.mxu0 %v2482_v9  ;;  %2434 = vmatprep.subr.mxu1 %v2482_v9 }
 0x1da   :  { %2404 = vmatpush3.xpose.msra.mxu0 %v1385_v3  ;;  %2435 = vmatpush3.xpose.msra.mxu1 %v2994_v43 }
 0x1db   :  { %2405 = vmatprep.subr.mxu0 %v2482_v9  ;;  %2436 = vmatprep.subr.mxu1 %v2482_v9 }
 0x1de   :  { %2406 = vmatpush3.xpose.msra.mxu0 %v1392_v63  ;;  %2437 = vmatpush3.xpose.msra.mxu1 %v3002_v54 }
 0x1df   :  { %2407 = vmatprep.subr.mxu0 %v2482_v9  ;;  %2438 = vmatprep.subr.mxu1 %v2482_v9 }
 0x1e2   :  { %2408 = vmatpush3.xpose.msra.mxu0 %v1399_v42  ;;  %2439 = vmatpush3.xpose.msra.mxu1 %v3014_v49 }
 0x1e3   :  { %2409 = vmatprep.subr.mxu0 %v2482_v9  ;;  %2440 = vmatprep.subr.mxu1 %v2482_v9 }
 0x1e6   :  { %2410 = vmatpush3.xpose.msra.mxu0 %v1406_v21  ;;  %2441 = vmatpush3.xpose.msra.mxu1 %v3027_v2 }
 0x1e7   :  { %2411 = vmatprep.subr.mxu0 %v2482_v9  ;;  %2442 = vmatprep.subr.mxu1 %v2482_v9 }
 0x1ea   :  { %2412 = vmatpush3.xpose.msra.mxu0 %v1413_v30  ;;  %2443 = vmatpush3.xpose.msra.mxu1 %v3046_v46 }
 0x1eb   :  { %2413 = vmatprep.subr.mxu0 %v2482_v9  ;;  %2444 = vmatprep.subr.mxu1 %v2482_v9 }
 0x1ee   :  { %2414 = vmatpush3.xpose.msra.mxu0 %v1420_v16  ;;  %2445 = vmatpush3.xpose.msra.mxu1 %v3054_v1 }
 0x1ef   :  { %2415 = vmatprep.subr.mxu0 %v2482_v9  ;;  %2446 = vmatprep.subr.mxu1 %v2482_v9 }
 0x1f2   :  { %2416 = vmatpush3.xpose.msra.mxu0 %v1427_v27  ;;  %2447 = vmatpush3.xpose.msra.mxu1 %v3077_v12 }
 0x1f3   :  { %2448 = vmatprep.subr.mxu1 %v2482_v9 }
 0x1f5   :  { %2418 = vmatmul.mubr.f32.vlgmr.msra.gmra.mxu0 %v3083_v50 }
 0x1f6   :  { %2449 = vmatpush3.xpose.msra.mxu1 %v3086_v11 }
 0x1f7   :  { %2450 = vmatprep.subr.mxu1 %v2482_v9 }
 0x1fa   :  { %2451 = vmatpush3.xpose.msra.mxu1 %v3107_v0 }
 0x1fd   :  { %2453 = vmatmul.mubr.f32.vlgmr.msra.gmra.mxu1 %v3083_v50 }
 0x235   :  { %v1315_v52 = vpop.f32.mrf.mxu0 }
 0x236   :  { %v1316_v47 = vadd.f32 %v1315_v52, %v1226_v55 }
 0x237   :  { %v2279_v10 = vpop.f32.mrf.mxu0 }
 0x23d   :  { %v1466_v40 = vpop.f32.mrf.mxu1 }
 0x23e   :  { %v1467_v56 = vadd.f32 %v1466_v40, %v1316_v47 }
 0x23f   :  { %v2314_v13 = vpop.f32.mrf.mxu1 }
 0x275   :  { %v1570_v62 = vpop.f32.mrf.mxu0 }
 0x276   :  { %v1571_v20 = vadd.f32 %v1570_v62, %v1467_v56 }
 0x277   :  { %v2349_v28 = vpop.f32.mrf.mxu0 }
 0x27d   :  { %v1659_v60 = vpop.f32.mrf.mxu1 }
 0x27e   :  { %v1660_v39 = vadd.f32 %v1659_v60, %v1571_v20 }
 0x27f   :  { %v2384_v26 = vpop.f32.mrf.mxu1 }
 0x2b5   :  { %v1778_v5 = vpop.f32.mrf.mxu0 }
 0x2b6   :  { %v1779_v9 = vadd.f32 %v1778_v5, %v1660_v39 }
 0x2b7   :  { %v2419_v36 = vpop.f32.mrf.mxu0 }
 0x2bd   :  { %v1865_v14 = vpop.f32.mrf.mxu1 }
 0x2be   :  { %v1866_v59 = vadd.f32 %v1865_v14, %v1779_v9 }
 0x2bf   :  { %v2454_v4 = vpop.f32.mrf.mxu1 }
 0x2c0   :  { %1869 = vst [vmem:[#allocation2] sm:$0xff] %v1866_v59 }
 0x2c1   :  { %2471 = shalt.err (!%p2468_p4)
}
 0x2c2   :  { %1879 = dma.vmem_to_hbm [thread:$0]  %s1877_s28, 128, %s3306_s5, [#allocation3]  }
 0x2c3   :  { %2480 = dma.done.wait [#allocation3], 128  }
 0x2c4   :  { %2481 = vsyncadd [#allocation3], 4294967168 }
 0x2c5   :  { %1883 = vsyncpa [#allocation3], 1 }

</bundles_post_ra>
